<compile_context>
chip_gen: v7x
topology: tpu7x:2x2x1
jax: 0.10.0
libtpu: 0.0.40
codegen_flags: <defaults>
</compile_context>

<pallas_src>
import math
import functools

import jax
import jax.numpy as jnp
from jax import lax
from jax.experimental import pallas as pl
from jax.experimental.pallas import tpu as pltpu

M = 256            # feature dim ("self.m" in the module; 1024 there, small here)
SEQ = 8            # frames per sequence
EPS = 1e-6
TARGET_ROWS = 128  # LHS rows per grid step (128 fills one MXU pass on all gens;
                   # 256 is slightly better on v6e/v7x if you don't need 2 steps)


def get_position_encoding(seq_len, d, n=100000):
    # plain-JAX glue (only used when pos_enc=True)
    k = jnp.arange(seq_len, dtype=jnp.float32)[:, None]
    div_term = jnp.exp(jnp.arange(0, d, 2, dtype=jnp.float32) * -(math.log(n) / d))
    pe = jnp.zeros((seq_len, d), dtype=jnp.float32)
    pe = pe.at[:, 0::2].set(jnp.sin(k * div_term))
    pe = pe.at[:, 1::2].set(jnp.cos(k * div_term))
    return pe[None]


def _layer_norm(y, gamma, beta):
    # torch: gamma * (x - mean) / (std + eps) + beta, std is Bessel-corrected
    m = y.shape[-1]
    mean = jnp.mean(y, axis=-1, keepdims=True)
    var = jnp.sum((y - mean) ** 2, axis=-1, keepdims=True) * (1.0 / (m - 1))
    inv = pl.reciprocal(jnp.sqrt(var) + EPS, approx=True)     # EUP vrcp
    return gamma * (y - mean) * inv + beta


def vasnet_kernel(x_ref, bias_ref, wkqv_ref, wo_ref, ka_w_ref, vecs_ref,
                  kd_b_ref, out_ref):
    x_bf = x_ref[...]                                   # (rows, m) bf16, rows = bt*n
    rows, m = x_bf.shape
    x = x_bf.astype(jnp.float32)

    vecs = vecs_ref[...]                                # (8, m) f32 packed vectors
    ka_b, kd_w = vecs[0:1, :], vecs[1:2, :]
    gy, by = vecs[2:3, :], vecs[3:4, :]
    gka, bka = vecs[4:5, :], vecs[5:6, :]

    # ---- fused K|Q|V projection: one MXU matmul -> (rows, 3m) ------------
    kqv = jnp.dot(x_bf, wkqv_ref[...], preferred_element_type=jnp.float32)
    K = kqv[:, 0 * m:1 * m]
    Q = kqv[:, 1 * m:2 * m]
    V = kqv[:, 2 * m:3 * m]

    # ---- block-diagonal attention over the packed sequences --------------
    # One (rows, rows) masked softmax keeps MXU operands large while staying
    # strictly per-sequence (bias_ref is 0 on-block, -1e30 off-block).
    logits = lax.dot_general(Q.astype(jnp.bfloat16), K.astype(jnp.bfloat16),
                             (((1,), (1,)), ((), ())),
                             preferred_element_type=jnp.float32) * 0.06
    logits = logits + bias_ref[...]
    logits = logits - jnp.max(logits, axis=-1, keepdims=True)
    p = jnp.exp(logits)
    att = p * pl.reciprocal(jnp.sum(p, axis=-1, keepdims=True), approx=True)

    # torch: y = (V^T @ att)^T == att^T @ V ; block-diagonal att keeps this
    # per-sequence.  Contract dim 0 of both -> no transpose materialized.
    y = lax.dot_general(att.astype(jnp.bfloat16), V.astype(jnp.bfloat16),
                        (((0,), (0,)), ((), ())),
                        preferred_element_type=jnp.float32)     # (rows, m)
    y = jnp.dot(y.astype(jnp.bfloat16), wo_ref[...],
                preferred_element_type=jnp.float32)             # output_linear

    # ---- residual + LayerNorm_y ------------------------------------------
    y = _layer_norm(y + x, gy, by)

    # ---- ka -> ReLU -> LayerNorm_ka ----------------------------------------
    y = jnp.dot(y.astype(jnp.bfloat16), ka_w_ref[...],
                preferred_element_type=jnp.float32) + ka_b
    y = jnp.maximum(y, 0.0)
    y = _layer_norm(y, gka, bka)

    # ---- kd + sigmoid, emitted lane-dense as one (1, rows) row --------------
    s = lax.dot_general(kd_w.astype(jnp.bfloat16), y.astype(jnp.bfloat16),
                        (((1,), (1,)), ((), ())),
                        preferred_element_type=jnp.float32)     # (1, rows)
    s = s + kd_b_ref[0]
    out_ref[...] = pl.reciprocal(1.0 + jnp.exp(-s), approx=True)   # sigmoid


def init_params(key, m=M):
    ks = jax.random.split(key, 8)
    scale = 0.02
    return {
        # attention weights, stored transposed as (in, out)
        "wk_t": jax.random.normal(ks[0], (m, m), jnp.float32) * scale,
        "wq_t": jax.random.normal(ks[1], (m, m), jnp.float32) * scale,
        "wv_t": jax.random.normal(ks[2], (m, m), jnp.float32) * scale,
        "wo_t": jax.random.normal(ks[3], (m, m), jnp.float32) * scale,
        # ka / kd linears (with bias); kd weight kept as a (1, m) row
        "ka_w_t": jax.random.normal(ks[4], (m, m), jnp.float32) * scale,
        "ka_b": jax.random.normal(ks[5], (1, m), jnp.float32) * scale,
        "kd_w": jax.random.normal(ks[6], (1, m), jnp.float32) * scale,
        "kd_b": jax.random.normal(ks[7], (1,), jnp.float32) * scale,
        # layer norms
        "gy": jnp.ones((1, m), jnp.float32),
        "by": jnp.zeros((1, m), jnp.float32),
        "gka": jnp.ones((1, m), jnp.float32),
        "bka": jnp.zeros((1, m), jnp.float32),
    }


@functools.partial(jax.jit, static_argnames=("pos_enc",))
def vasnet_forward(x, params, pos_enc=False):
    # x may be (seq, m) or (B, seq, m).  B=1 matches torch's x.view(-1, m).
    if x.ndim == 2:
        x = x[None]
    B, n, m = x.shape
    if pos_enc:
        x = x + get_position_encoding(n, m)

    # Pack bt sequences (bt*n rows) per grid step; pad the batch to a multiple
    # of bt with zeros (padded rows are sliced off at the end).
    bt = max(1, min(B, TARGET_ROWS // n))
    num_steps = (B + bt - 1) // bt
    b_pad = num_steps * bt
    if b_pad != B:
        x = jnp.concatenate([x, jnp.zeros((b_pad - B, n, m), x.dtype)], axis=0)
    rows = bt * n

    x_bf = x.reshape(b_pad * n, m).astype(jnp.bfloat16)

    # Block-diagonal additive bias (built once on host side of the kernel):
    # 0 within a sequence's n x n block, -1e30 elsewhere.
    seq_ids = jnp.repeat(jnp.arange(bt, dtype=jnp.int32), n)
    att_bias = jnp.where(seq_ids[:, None] == seq_ids[None, :],
                         0.0, -1e30).astype(jnp.float32)          # (rows, rows)

    # bf16 matmul operands; K|Q|V fused into one (m, 3m) weight.
    wkqv = jnp.concatenate([params["wk_t"], params["wq_t"], params["wv_t"]],
                           axis=1).astype(jnp.bfloat16)
    wo = params["wo_t"].astype(jnp.bfloat16)
    ka_w = params["ka_w_t"].astype(jnp.bfloat16)

    # Six (1, m) f32 vectors packed into one aligned (8, m) tile (single DMA).
    vecs = jnp.concatenate([params["ka_b"], params["kd_w"],
                            params["gy"], params["by"],
                            params["gka"], params["bka"],
                            jnp.zeros((2, m), jnp.float32)], axis=0)

    const2d = lambda i: (0, 0)   # same block every step -> stays VMEM-resident
    in_specs = [
        pl.BlockSpec((rows, m), lambda i: (i, 0)),          # x rows for this step
        pl.BlockSpec((rows, rows), const2d),                # block-diag attention bias
        pl.BlockSpec((m, 3 * m), const2d),                  # fused K|Q|V weight
        pl.BlockSpec((m, m), const2d),                      # output_linear weight
        pl.BlockSpec((m, m), const2d),                      # ka weight
        pl.BlockSpec((8, m), const2d),                      # packed (1, m) vectors
        pl.BlockSpec(memory_space=pltpu.MemorySpace.SMEM),  # kd bias scalar
    ]

    out = pl.pallas_call(
        vasnet_kernel,
        out_shape=jax.ShapeDtypeStruct((num_steps, 1, rows), jnp.float32),
        grid=(num_steps,),
        in_specs=in_specs,
        out_specs=pl.BlockSpec((None, 1, rows), lambda i: (i, 0, 0)),
        compiler_params=pltpu.CompilerParams(
            dimension_semantics=("parallel",)),   # megacore-shardable on v7x
    )(x_bf, att_bias, wkqv, wo, ka_w, vecs, params["kd_b"])

    # drop padded rows, mirror torch's y.view(1, -1)
    return out.reshape(-1)[: B * n].reshape(1, -1)


# ---------------------------- pure-JAX reference ----------------------------

def _layer_norm_ref(y, gamma, beta):
    m = y.shape[-1]
    mean = jnp.mean(y, axis=-1, keepdims=True)
    var = jnp.sum((y - mean) ** 2, axis=-1, keepdims=True) / (m - 1)
    return gamma * (y - mean) / (jnp.sqrt(var) + EPS) + beta


def vasnet_reference(x, params):
    """Pure-JAX f32 reference reproducing the PyTorch forward (eval mode),
    applied per sequence."""
    if x.ndim == 2:
        x = x[None]
    x = x.astype(jnp.float32)

    def per_seq(xb):
        K = xb @ params["wk_t"]
        Q = xb @ params["wq_t"] * 0.06
        V = xb @ params["wv_t"]
        att = jax.nn.softmax(Q @ K.T, axis=-1)
        y = (V.T @ att).T @ params["wo_t"]
        y = _layer_norm_ref(y + xb, params["gy"], params["by"])
        y = jnp.maximum(y @ params["ka_w_t"] + params["ka_b"], 0.0)
        y = _layer_norm_ref(y, params["gka"], params["bka"])
        return jax.nn.sigmoid(jnp.sum(y * params["kd_w"], axis=-1)
                              + params["kd_b"][0])

    return jax.vmap(per_seq)(x).reshape(1, -1)


if __name__ == "__main__":
    key = jax.random.PRNGKey(0)
    k_x, k_xb, k_xc, k_p = jax.random.split(key, 4)
    params = init_params(k_p)

    # B=1: exactly the PyTorch forward semantics (single grid step, 8 rows).
    x = jax.random.normal(k_x, (SEQ, M), jnp.float32)
    out = jax.block_until_ready(vasnet_forward(x, params))
    ref = vasnet_reference(x, params)
    assert out.shape == (1, SEQ), out.shape
    assert jnp.allclose(out, ref, atol=2e-2, rtol=2e-2), (out, ref)

    # B=32: 16 sequences (128 rows) packed per grid step -> 2 parallel steps.
    xb = jax.random.normal(k_xb, (32, SEQ, M), jnp.float32)
    outb = jax.block_until_ready(vasnet_forward(xb, params))
    refb = vasnet_reference(xb, params)
    assert outb.shape == (1, 32 * SEQ), outb.shape
    assert jnp.allclose(outb, refb, atol=2e-2, rtol=2e-2), (outb, refb)

    # B=20: exercises the zero-padding path (padded to 32 sequences).
    xc = jax.random.normal(k_xc, (20, SEQ, M), jnp.float32)
    outc = jax.block_until_ready(vasnet_forward(xc, params))
    refc = vasnet_reference(xc, params)
    assert outc.shape == (1, 20 * SEQ), outc.shape
    assert jnp.allclose(outc, refc, atol=2e-2, rtol=2e-2), (outc, refc)

    print("KERNEL_OK")
</pallas_src>

<mosaic_0001>
module attributes {stable_mosaic.version = 11 : i64} {
  func.func @vasnet_kernel(%arg0: i32, %arg1: memref<8x256xbf16, #tpu.memory_space<vmem>>, %arg2: memref<8x8xf32, #tpu.memory_space<vmem>>, %arg3: memref<256x768xbf16, #tpu.memory_space<vmem>>, %arg4: memref<256x256xbf16, #tpu.memory_space<vmem>>, %arg5: memref<256x256xbf16, #tpu.memory_space<vmem>>, %arg6: memref<8x256xf32, #tpu.memory_space<vmem>>, %arg7: memref<1xf32, #tpu.memory_space<smem>>, %arg8: memref<1x1x8xf32, #tpu.memory_space<vmem>>) attributes {dimension_semantics = [#tpu.dimension_semantics<parallel>], iteration_bounds = array<i64: 1>, scalar_prefetch = 0 : i64, scratch_operands = 0 : i64, tpu.core_type = #tpu.core_type<tc>, window_params = [{transform_indices = @transform_0, window_bounds = array<i64: 8, 256>}, {pipeline_mode = #tpu.pipeline_mode<synchronous>, transform_indices = @transform_1, window_bounds = array<i64: 8, 8>}, {pipeline_mode = #tpu.pipeline_mode<synchronous>, transform_indices = @transform_2, window_bounds = array<i64: 256, 768>}, {pipeline_mode = #tpu.pipeline_mode<synchronous>, transform_indices = @transform_3, window_bounds = array<i64: 256, 256>}, {pipeline_mode = #tpu.pipeline_mode<synchronous>, transform_indices = @transform_4, window_bounds = array<i64: 256, 256>}, {pipeline_mode = #tpu.pipeline_mode<synchronous>, transform_indices = @transform_5, window_bounds = array<i64: 8, 256>}, {transform_indices = @transform_6, window_bounds = array<i64: 1>}, {transform_indices = @transform_7, window_bounds = array<i64: 1, 1, 8>}]} {
    %c0 = arith.constant 0 : index
    %c0_0 = arith.constant 0 : index
    %0 = vector.load %arg1[%c0, %c0_0] : memref<8x256xbf16, #tpu.memory_space<vmem>>, vector<8x256xbf16>
    %1 = arith.extf %0 : vector<8x256xbf16> to vector<8x256xf32>
    %c0_1 = arith.constant 0 : index
    %c0_2 = arith.constant 0 : index
    %2 = vector.load %arg6[%c0_1, %c0_2] : memref<8x256xf32, #tpu.memory_space<vmem>>, vector<8x256xf32>
    %3 = vector.extract_strided_slice %2 {offsets = [0, 0], sizes = [1, 256], strides = [1, 1]} : vector<8x256xf32> to vector<1x256xf32>
    %4 = vector.extract_strided_slice %2 {offsets = [1, 0], sizes = [1, 256], strides = [1, 1]} : vector<8x256xf32> to vector<1x256xf32>
    %5 = vector.extract_strided_slice %2 {offsets = [2, 0], sizes = [1, 256], strides = [1, 1]} : vector<8x256xf32> to vector<1x256xf32>
    %6 = vector.extract_strided_slice %2 {offsets = [3, 0], sizes = [1, 256], strides = [1, 1]} : vector<8x256xf32> to vector<1x256xf32>
    %7 = vector.extract_strided_slice %2 {offsets = [4, 0], sizes = [1, 256], strides = [1, 1]} : vector<8x256xf32> to vector<1x256xf32>
    %8 = vector.extract_strided_slice %2 {offsets = [5, 0], sizes = [1, 256], strides = [1, 1]} : vector<8x256xf32> to vector<1x256xf32>
    %c0_3 = arith.constant 0 : index
    %c0_4 = arith.constant 0 : index
    %9 = vector.load %arg3[%c0_3, %c0_4] : memref<256x768xbf16, #tpu.memory_space<vmem>>, vector<256x768xbf16>
    %cst = arith.constant dense<0.000000e+00> : vector<8x768xf32>
    %10 = tpu.matmul %0, %9, %cst {dimension_numbers = #tpu.dot_dimension_numbers<[1], [0], [0], [1], [0, 0, 1, 1], [], []>} : vector<8x256xbf16>, vector<256x768xbf16>, vector<8x768xf32> -> vector<8x768xf32>
    %11 = vector.extract_strided_slice %10 {offsets = [0, 0], sizes = [8, 256], strides = [1, 1]} : vector<8x768xf32> to vector<8x256xf32>
    %12 = vector.extract_strided_slice %10 {offsets = [0, 256], sizes = [8, 256], strides = [1, 1]} : vector<8x768xf32> to vector<8x256xf32>
    %13 = vector.extract_strided_slice %10 {offsets = [0, 512], sizes = [8, 256], strides = [1, 1]} : vector<8x768xf32> to vector<8x256xf32>
    %14 = arith.truncf %12 : vector<8x256xf32> to vector<8x256xbf16>
    %15 = arith.truncf %11 : vector<8x256xf32> to vector<8x256xbf16>
    %cst_5 = arith.constant dense<0.000000e+00> : vector<8x8xf32>
    %16 = tpu.matmul %14, %15, %cst_5 {dimension_numbers = #tpu.dot_dimension_numbers<[1], [1], [0], [0], [0, 0, 1, 0], [], []>} : vector<8x256xbf16>, vector<8x256xbf16>, vector<8x8xf32> -> vector<8x8xf32>
    %cst_6 = arith.constant 6.000000e-02 : f32
    %17 = vector.broadcast %cst_6 : f32 to vector<8x8xf32>
    %18 = arith.mulf %16, %17 : vector<8x8xf32>
    %c0_7 = arith.constant 0 : index
    %c0_8 = arith.constant 0 : index
    %19 = vector.load %arg2[%c0_7, %c0_8] : memref<8x8xf32, #tpu.memory_space<vmem>>, vector<8x8xf32>
    %20 = arith.addf %18, %19 : vector<8x8xf32>
    %cst_9 = arith.constant dense<0xFF800000> : vector<8xf32>
    %21 = vector.multi_reduction <maximumf>, %20, %cst_9 [1] : vector<8x8xf32> to vector<8xf32>
    %22 = vector.shape_cast %21 : vector<8xf32> to vector<8x1xf32>
    %23 = vector.broadcast %22 : vector<8x1xf32> to vector<8x8xf32>
    %24 = arith.subf %20, %23 : vector<8x8xf32>
    %25 = math.exp %24 : vector<8x8xf32>
    %cst_10 = arith.constant dense<0.000000e+00> : vector<8xf32>
    %26 = vector.multi_reduction <add>, %25, %cst_10 [1] : vector<8x8xf32> to vector<8xf32>
    %27 = vector.shape_cast %26 : vector<8xf32> to vector<8x1xf32>
    %28 = tpu.reciprocal %27 {approx = true} : vector<8x1xf32> -> vector<8x1xf32>
    %29 = vector.broadcast %28 : vector<8x1xf32> to vector<8x8xf32>
    %30 = arith.mulf %25, %29 : vector<8x8xf32>
    %31 = arith.truncf %30 : vector<8x8xf32> to vector<8x8xbf16>
    %32 = arith.truncf %13 : vector<8x256xf32> to vector<8x256xbf16>
    %cst_11 = arith.constant dense<0.000000e+00> : vector<8x256xf32>
    %33 = tpu.matmul %31, %32, %cst_11 {dimension_numbers = #tpu.dot_dimension_numbers<[0], [0], [1], [1], [0, 1, 1, 1], [], []>} : vector<8x8xbf16>, vector<8x256xbf16>, vector<8x256xf32> -> vector<8x256xf32>
    %34 = arith.truncf %33 : vector<8x256xf32> to vector<8x256xbf16>
    %c0_12 = arith.constant 0 : index
    %c0_13 = arith.constant 0 : index
    %35 = vector.load %arg4[%c0_12, %c0_13] : memref<256x256xbf16, #tpu.memory_space<vmem>>, vector<256x256xbf16>
    %cst_14 = arith.constant dense<0.000000e+00> : vector<8x256xf32>
    %36 = tpu.matmul %34, %35, %cst_14 {dimension_numbers = #tpu.dot_dimension_numbers<[1], [0], [0], [1], [0, 0, 1, 1], [], []>} : vector<8x256xbf16>, vector<256x256xbf16>, vector<8x256xf32> -> vector<8x256xf32>
    %37 = arith.addf %36, %1 : vector<8x256xf32>
    %cst_15 = arith.constant dense<0.000000e+00> : vector<8xf32>
    %38 = vector.multi_reduction <add>, %37, %cst_15 [1] : vector<8x256xf32> to vector<8xf32>
    %39 = vector.shape_cast %38 : vector<8xf32> to vector<8x1xf32>
    %cst_16 = arith.constant 2.560000e+02 : f32
    %40 = vector.broadcast %cst_16 : f32 to vector<8x1xf32>
    %41 = arith.divf %39, %40 : vector<8x1xf32>
    %42 = vector.broadcast %41 : vector<8x1xf32> to vector<8x256xf32>
    %43 = arith.subf %37, %42 : vector<8x256xf32>
    %44 = arith.mulf %43, %43 : vector<8x256xf32>
    %cst_17 = arith.constant dense<0.000000e+00> : vector<8xf32>
    %45 = vector.multi_reduction <add>, %44, %cst_17 [1] : vector<8x256xf32> to vector<8xf32>
    %46 = vector.shape_cast %45 : vector<8xf32> to vector<8x1xf32>
    %cst_18 = arith.constant 0.00392156886 : f32
    %47 = vector.broadcast %cst_18 : f32 to vector<8x1xf32>
    %48 = arith.mulf %46, %47 : vector<8x1xf32>
    %49 = math.sqrt %48 : vector<8x1xf32>
    %cst_19 = arith.constant 9.99999997E-7 : f32
    %50 = vector.broadcast %cst_19 : f32 to vector<8x1xf32>
    %51 = arith.addf %49, %50 : vector<8x1xf32>
    %52 = tpu.reciprocal %51 {approx = true} : vector<8x1xf32> -> vector<8x1xf32>
    %53 = vector.broadcast %41 : vector<8x1xf32> to vector<8x256xf32>
    %54 = arith.subf %37, %53 : vector<8x256xf32>
    %55 = vector.broadcast %5 : vector<1x256xf32> to vector<8x256xf32>
    %56 = arith.mulf %55, %54 : vector<8x256xf32>
    %57 = vector.broadcast %52 : vector<8x1xf32> to vector<8x256xf32>
    %58 = arith.mulf %56, %57 : vector<8x256xf32>
    %59 = vector.broadcast %6 : vector<1x256xf32> to vector<8x256xf32>
    %60 = arith.addf %58, %59 : vector<8x256xf32>
    %61 = arith.truncf %60 : vector<8x256xf32> to vector<8x256xbf16>
    %c0_20 = arith.constant 0 : index
    %c0_21 = arith.constant 0 : index
    %62 = vector.load %arg5[%c0_20, %c0_21] : memref<256x256xbf16, #tpu.memory_space<vmem>>, vector<256x256xbf16>
    %cst_22 = arith.constant dense<0.000000e+00> : vector<8x256xf32>
    %63 = tpu.matmul %61, %62, %cst_22 {dimension_numbers = #tpu.dot_dimension_numbers<[1], [0], [0], [1], [0, 0, 1, 1], [], []>} : vector<8x256xbf16>, vector<256x256xbf16>, vector<8x256xf32> -> vector<8x256xf32>
    %64 = vector.broadcast %3 : vector<1x256xf32> to vector<8x256xf32>
    %65 = arith.addf %63, %64 : vector<8x256xf32>
    %cst_23 = arith.constant 0.000000e+00 : f32
    %66 = vector.broadcast %cst_23 : f32 to vector<8x256xf32>
    %67 = arith.maximumf %65, %66 : vector<8x256xf32>
    %cst_24 = arith.constant dense<0.000000e+00> : vector<8xf32>
    %68 = vector.multi_reduction <add>, %67, %cst_24 [1] : vector<8x256xf32> to vector<8xf32>
    %69 = vector.shape_cast %68 : vector<8xf32> to vector<8x1xf32>
    %cst_25 = arith.constant 2.560000e+02 : f32
    %70 = vector.broadcast %cst_25 : f32 to vector<8x1xf32>
    %71 = arith.divf %69, %70 : vector<8x1xf32>
    %72 = vector.broadcast %71 : vector<8x1xf32> to vector<8x256xf32>
    %73 = arith.subf %67, %72 : vector<8x256xf32>
    %74 = arith.mulf %73, %73 : vector<8x256xf32>
    %cst_26 = arith.constant dense<0.000000e+00> : vector<8xf32>
    %75 = vector.multi_reduction <add>, %74, %cst_26 [1] : vector<8x256xf32> to vector<8xf32>
    %76 = vector.shape_cast %75 : vector<8xf32> to vector<8x1xf32>
    %cst_27 = arith.constant 0.00392156886 : f32
    %77 = vector.broadcast %cst_27 : f32 to vector<8x1xf32>
    %78 = arith.mulf %76, %77 : vector<8x1xf32>
    %79 = math.sqrt %78 : vector<8x1xf32>
    %cst_28 = arith.constant 9.99999997E-7 : f32
    %80 = vector.broadcast %cst_28 : f32 to vector<8x1xf32>
    %81 = arith.addf %79, %80 : vector<8x1xf32>
    %82 = tpu.reciprocal %81 {approx = true} : vector<8x1xf32> -> vector<8x1xf32>
    %83 = vector.broadcast %71 : vector<8x1xf32> to vector<8x256xf32>
    %84 = arith.subf %67, %83 : vector<8x256xf32>
    %85 = vector.broadcast %7 : vector<1x256xf32> to vector<8x256xf32>
    %86 = arith.mulf %85, %84 : vector<8x256xf32>
    %87 = vector.broadcast %82 : vector<8x1xf32> to vector<8x256xf32>
    %88 = arith.mulf %86, %87 : vector<8x256xf32>
    %89 = vector.broadcast %8 : vector<1x256xf32> to vector<8x256xf32>
    %90 = arith.addf %88, %89 : vector<8x256xf32>
    %91 = arith.truncf %4 : vector<1x256xf32> to vector<1x256xbf16>
    %92 = arith.truncf %90 : vector<8x256xf32> to vector<8x256xbf16>
    %cst_29 = arith.constant dense<0.000000e+00> : vector<1x8xf32>
    %93 = tpu.matmul %91, %92, %cst_29 {dimension_numbers = #tpu.dot_dimension_numbers<[1], [1], [0], [0], [0, 0, 1, 0], [], []>} : vector<1x256xbf16>, vector<8x256xbf16>, vector<1x8xf32> -> vector<1x8xf32>
    %c0_30 = arith.constant 0 : index
    %94 = memref.load %arg7[%c0_30] : memref<1xf32, #tpu.memory_space<smem>>
    %95 = vector.broadcast %94 : f32 to vector<1x8xf32>
    %96 = arith.addf %93, %95 : vector<1x8xf32>
    %cst_31 = arith.constant 0.000000e+00 : f32
    %97 = vector.broadcast %cst_31 : f32 to vector<1x8xf32>
    %98 = arith.subf %97, %96 : vector<1x8xf32>
    %99 = math.exp %98 : vector<1x8xf32>
    %cst_32 = arith.constant 1.000000e+00 : f32
    %100 = vector.broadcast %cst_32 : f32 to vector<1x8xf32>
    %101 = arith.addf %100, %99 : vector<1x8xf32>
    %102 = tpu.reciprocal %101 {approx = true} : vector<1x8xf32> -> vector<1x8xf32>
    %c0_33 = arith.constant 0 : index
    %c0_34 = arith.constant 0 : index
    %c0_35 = arith.constant 0 : index
    %103 = vector.load %arg8[%c0_33, %c0_34, %c0_35] : memref<1x1x8xf32, #tpu.memory_space<vmem>>, vector<1x1x8xf32>
    %104 = vector.shape_cast %103 : vector<1x1x8xf32> to vector<1x8xf32>
    %105 = vector.shape_cast %102 : vector<1x8xf32> to vector<1x1x8xf32>
    tpu.vector_store %arg8[%c0_33, %c0_34, %c0_35], %105 {strides = array<i32>} : memref<1x1x8xf32, #tpu.memory_space<vmem>>, vector<1x1x8xf32>,
    return
  }
  func.func @transform_0(%arg0: i32) -> (i32, i32) {
    %c0_i32 = arith.constant 0 : i32
    %c0_i32_0 = arith.constant 0 : i32
    return %arg0, %c0_i32 : i32, i32
  }
  func.func @transform_1(%arg0: i32) -> (i32, i32) {
    %c0_i32 = arith.constant 0 : i32
    %c0_i32_0 = arith.constant 0 : i32
    %c0_i32_1 = arith.constant 0 : i32
    return %c0_i32, %c0_i32_0 : i32, i32
  }
  func.func @transform_2(%arg0: i32) -> (i32, i32) {
    %c0_i32 = arith.constant 0 : i32
    %c0_i32_0 = arith.constant 0 : i32
    %c0_i32_1 = arith.constant 0 : i32
    return %c0_i32, %c0_i32_0 : i32, i32
  }
  func.func @transform_3(%arg0: i32) -> (i32, i32) {
    %c0_i32 = arith.constant 0 : i32
    %c0_i32_0 = arith.constant 0 : i32
    %c0_i32_1 = arith.constant 0 : i32
    return %c0_i32, %c0_i32_0 : i32, i32
  }
  func.func @transform_4(%arg0: i32) -> (i32, i32) {
    %c0_i32 = arith.constant 0 : i32
    %c0_i32_0 = arith.constant 0 : i32
    %c0_i32_1 = arith.constant 0 : i32
    return %c0_i32, %c0_i32_0 : i32, i32
  }
  func.func @transform_5(%arg0: i32) -> (i32, i32) {
    %c0_i32 = arith.constant 0 : i32
    %c0_i32_0 = arith.constant 0 : i32
    %c0_i32_1 = arith.constant 0 : i32
    return %c0_i32, %c0_i32_0 : i32, i32
  }
  func.func @transform_6(%arg0: i32) -> i32 {
    %c0_i32 = arith.constant 0 : i32
    %c0_i32_0 = arith.constant 0 : i32
    return %c0_i32 : i32
  }
  func.func @transform_7(%arg0: i32) -> (i32, i32, i32) {
    %c0_i32 = arith.constant 0 : i32
    %c0_i32_0 = arith.constant 0 : i32
    %c0_i32_1 = arith.constant 0 : i32
    return %arg0, %c0_i32, %c0_i32_0 : i32, i32, i32
  }
}

</mosaic_0001>

<bundles_post_ra>
// kernel: vasnet_forward.1
= control target key start
LH: loop header
LB: loop body
LE: loop exit
PB: predicated region body
PF: predicated region fallthrough
CT: control target
= control target key end

     0   :  { %s2540_s0 = inlined_call_operand.vmem [shape: bf16[8,256], index: 0, kind: input, shape index: {}]   ;;  %s2541_s1 = inlined_call_operand.vmem [shape: f32[8,8], index: 1, kind: input, shape index: {}]   ;;  %s2542_s2 = inlined_call_operand.vmem [shape: bf16[256,768], index: 2, kind: input, shape index: {}]   ;;  %s2543_s3 = inlined_call_operand.vmem [shape: bf16[256,256], index: 3, kind: input, shape index: {}]   ;;  %s2544_s4 = inlined_call_operand.vmem [shape: bf16[256,256], index: 4, kind: input, shape index: {}]   ;;  %s2545_s5 = inlined_call_operand.vmem [shape: f32[8,256], index: 5, kind: input, shape index: {}]   ;;  %s2546_s6 = inlined_call_operand.<no memory space> [shape: f32[1], index: 6, kind: input, shape index: {}]   ;;  %s2547_s7 = inlined_call_operand.hbm [shape: f32[1,1,8], index: 7, kind: output, shape index: {}]  }
   0x1   :  { %v1677_v0 = vld [vmem:[%s2542_s2 + $0x4] ss:$24 sps:$4 sm:$0xff]   ;;  %v1679_v1 = vld [vmem:[%s2542_s2] ss:$24 sps:$4 sm:$0xff]   ;;  %v1680_v2 = vld [vmem:[%s2542_s2 + $0x34] ss:$24 sps:$4 sm:$0xff]  }
   0x2   :  { %617 = vmatprep.subr.bf16.mxu0 %v1677_v0  ;;  %v1682_v3 = vld [vmem:[%s2542_s2 + $0xc] ss:$24 sps:$4 sm:$0xff]   ;;  %v1684_v4 = vld [vmem:[%s2542_s2 + $0x30] ss:$24 sps:$4 sm:$0xff]   ;;  %v1688_v7 = vld [vmem:[%s2542_s2 + $0x3c] ss:$24 sps:$4 sm:$0xff]  }
   0x3   :  { %618 = vmatpush1.bf16.msra.mxu0 %v1679_v1  ;;  %v1685_v5 = vld [vmem:[%s2542_s2 + $0x8] ss:$24 sps:$4 sm:$0xff]   ;;  %v1686_v6 = vld [vmem:[%s2542_s2 + $0x64] ss:$24 sps:$4 sm:$0xff]   ;;  %658 = vmatprep.subr.bf16.mxu1 %v1682_v3  ;;  %v1691_v8 = vld [vmem:[%s2542_s2 + $0x38] ss:$24 sps:$4 sm:$0xff]  }
   0x4   :  { %619 = vmatprep.subr.bf16.mxu0 %v1680_v2  ;;  %659 = vmatpush1.bf16.msra.mxu1 %v1685_v5  ;;  %v1690_v9 = vld [vmem:[%s2542_s2 + $0x60] ss:$24 sps:$4 sm:$0xff]   ;;  %v1692_v10 = vld [vmem:[%s2542_s2 + $0x94] ss:$24 sps:$4 sm:$0xff]   ;;  %v1696_v13 = vld [vmem:[%s2542_s2 + $0x90] ss:$24 sps:$4 sm:$0xff]  }
   0x5   :  { %660 = vmatprep.subr.bf16.mxu1 %v1688_v7  ;;  %v1694_v11 = vld [vmem:[%s2542_s2 + $0x6c] ss:$24 sps:$4 sm:$0xff]   ;;  %v1697_v12 = vld [vmem:[%s2542_s2 + $0x68] ss:$24 sps:$4 sm:$0xff]   ;;  %v1700_v14 = vld [vmem:[%s2542_s2 + $0x9c] ss:$24 sps:$4 sm:$0xff]  }
   0x6   :  { %v1698_v15 = vld [vmem:[%s2542_s2 + $0xc4] ss:$24 sps:$4 sm:$0xff]   ;;  %v1702_v16 = vld [vmem:[%s2542_s2 + $0xc0] ss:$24 sps:$4 sm:$0xff]   ;;  %v1704_v19 = vld [vmem:[%s2542_s2 + $0xf4] ss:$24 sps:$4 sm:$0xff]  }
   0x7   :  { %620 = vmatpush1.bf16.msra.mxu0 %v1684_v4  ;;  %v1703_v17 = vld [vmem:[%s2542_s2 + $0x98] ss:$24 sps:$4 sm:$0xff]   ;;  %v1706_v18 = vld [vmem:[%s2542_s2 + $0xcc] ss:$24 sps:$4 sm:$0xff]   ;;  %v1709_v20 = vld [vmem:[%s2542_s2 + $0xc8] ss:$24 sps:$4 sm:$0xff]  }
   0x8   :  { %621 = vmatprep.subr.bf16.mxu0 %v1686_v6  ;;  %661 = vmatpush1.bf16.msra.mxu1 %v1691_v8  ;;  %v1708_v21 = vld [vmem:[%s2542_s2 + $0xf0] ss:$24 sps:$4 sm:$0xff]   ;;  %v1712_v22 = vld [vmem:[%s2542_s2 + $0xfc] ss:$24 sps:$4 sm:$0xff]   ;;  %v1714_v24 = vld [vmem:[%s2542_s2 + $0x120] ss:$24 sps:$4 sm:$0xff]  }
   0x9   :  { %662 = vmatprep.subr.bf16.mxu1 %v1694_v11  ;;  %v1710_v23 = vld [vmem:[%s2542_s2 + $0x124] ss:$24 sps:$4 sm:$0xff]   ;;  %v1715_v25 = vld [vmem:[%s2542_s2 + $0xf8] ss:$24 sps:$4 sm:$0xff]   ;;  %v1716_v27 = vld [vmem:[%s2542_s2 + $0x154] ss:$24 sps:$4 sm:$0xff]  }
   0xa   :  { %v1718_v26 = vld [vmem:[%s2542_s2 + $0x12c] ss:$24 sps:$4 sm:$0xff]   ;;  %v1721_v28 = vld [vmem:[%s2542_s2 + $0x128] ss:$24 sps:$4 sm:$0xff]   ;;  %v1724_v30 = vld [vmem:[%s2542_s2 + $0x15c] ss:$24 sps:$4 sm:$0xff]  }
   0xb   :  { %622 = vmatpush1.bf16.msra.mxu0 %v1690_v9  ;;  %v1720_v29 = vld [vmem:[%s2542_s2 + $0x150] ss:$24 sps:$4 sm:$0xff]   ;;  %v1722_v31 = vld [vmem:[%s2542_s2 + $0x184] ss:$24 sps:$4 sm:$0xff]   ;;  %v1726_v32 = vld [vmem:[%s2542_s2 + $0x180] ss:$24 sps:$4 sm:$0xff]  }
   0xc   :  { %623 = vmatprep.subr.bf16.mxu0 %v1692_v10  ;;  %663 = vmatpush1.bf16.msra.mxu1 %v1697_v12  ;;  %v1727_v33 = vld [vmem:[%s2542_s2 + $0x158] ss:$24 sps:$4 sm:$0xff]   ;;  %v1730_v34 = vld [vmem:[%s2542_s2 + $0x18c] ss:$24 sps:$4 sm:$0xff]   ;;  %v1733_v36 = vld [vmem:[%s2542_s2 + $0x188] ss:$24 sps:$4 sm:$0xff]  }
   0xd   :  { %664 = vmatprep.subr.bf16.mxu1 %v1700_v14  ;;  %v1728_v35 = vld [vmem:[%s2542_s2 + $0x1b4] ss:$24 sps:$4 sm:$0xff]   ;;  %v1732_v37 = vld [vmem:[%s2542_s2 + $0x1b0] ss:$24 sps:$4 sm:$0xff]   ;;  %v1734_v39 = vld [vmem:[%s2542_s2 + $0x1e4] ss:$24 sps:$4 sm:$0xff]  }
   0xe   :  { %v1736_v38 = vld [vmem:[%s2542_s2 + $0x1bc] ss:$24 sps:$4 sm:$0xff]   ;;  %v1738_v40 = vld [vmem:[%s2542_s2 + $0x1e0] ss:$24 sps:$4 sm:$0xff]   ;;  %v1742_v42 = vld [vmem:[%s2542_s2 + $0x1ec] ss:$24 sps:$4 sm:$0xff]  }
   0xf   :  { %624 = vmatpush1.bf16.msra.mxu0 %v1696_v13  ;;  %v1739_v41 = vld [vmem:[%s2542_s2 + $0x1b8] ss:$24 sps:$4 sm:$0xff]   ;;  %v1740_v43 = vld [vmem:[%s2542_s2 + $0x214] ss:$24 sps:$4 sm:$0xff]   ;;  %v1745_v45 = vld [vmem:[%s2542_s2 + $0x1e8] ss:$24 sps:$4 sm:$0xff]  }
  0x10   :  { %625 = vmatprep.subr.bf16.mxu0 %v1698_v15  ;;  %665 = vmatpush1.bf16.msra.mxu1 %v1703_v17  ;;  %v1744_v44 = vld [vmem:[%s2542_s2 + $0x210] ss:$24 sps:$4 sm:$0xff]   ;;  %v2142_v46 = vld [vmem:[%s2540_s0] sm:$0xff]  ;;  %v1748_v48 = vld [vmem:[%s2542_s2 + $0x21c] ss:$24 sps:$4 sm:$0xff]  }
  0x11   :  { %666 = vmatprep.subr.bf16.mxu1 %v1706_v18  ;;  %v1746_v47 = vld [vmem:[%s2542_s2 + $0x244] ss:$24 sps:$4 sm:$0xff]   ;;  %v1512_v49 = vcombine.high %v2142_v46, %v2142_v46  ;;  %v1751_v50 = vld [vmem:[%s2542_s2 + $0x218] ss:$24 sps:$4 sm:$0xff]   ;;  %v1752_v53 = vld [vmem:[%s2542_s2 + $0x274] ss:$24 sps:$4 sm:$0xff]   ;;  %v2202_v2 = vcombine.low %v2142_v46, %v2142_v46 }
  0x12   :  { %v1750_v51 = vld [vmem:[%s2542_s2 + $0x240] ss:$24 sps:$4 sm:$0xff]   ;;  %v1754_v52 = vld [vmem:[%s2542_s2 + $0x24c] ss:$24 sps:$4 sm:$0xff]   ;;  %v1756_v55 = vld [vmem:[%s2542_s2 + $0x270] ss:$24 sps:$4 sm:$0xff]  }
  0x13   :  { %626 = vmatpush1.bf16.msra.mxu0 %v1702_v16  ;;  %649 = vmatprep.mubr.bf16.mxu0 %v1512_v49  ;;  %v1757_v54 = vld [vmem:[%s2542_s2 + $0x248] ss:$24 sps:$4 sm:$0xff]   ;;  %v1760_v56 = vld [vmem:[%s2542_s2 + $0x27c] ss:$24 sps:$4 sm:$0xff]   ;;  %v1763_v58 = vld [vmem:[%s2542_s2 + $0x278] ss:$24 sps:$4 sm:$0xff]  }
  0x14   :  { %627 = vmatprep.subr.bf16.mxu0 %v1704_v19  ;;  %667 = vmatpush1.bf16.msra.mxu1 %v1709_v20  ;;  %v1758_v57 = vld [vmem:[%s2542_s2 + $0x2a4] ss:$24 sps:$4 sm:$0xff]   ;;  %v1762_v59 = vld [vmem:[%s2542_s2 + $0x2a0] ss:$24 sps:$4 sm:$0xff]   ;;  %v1764_v61 = vld [vmem:[%s2542_s2 + $0x2d4] ss:$24 sps:$4 sm:$0xff]  }
  0x15   :  { %668 = vmatprep.subr.bf16.mxu1 %v1712_v22  ;;  %690 = vmatprep.mubr.bf16.mxu1 %v1512_v49  ;;  %v1766_v60 = vld [vmem:[%s2542_s2 + $0x2ac] ss:$24 sps:$4 sm:$0xff]   ;;  %v1769_v62 = vld [vmem:[%s2542_s2 + $0x2a8] ss:$24 sps:$4 sm:$0xff]   ;;  %v1772_v0 = vld [vmem:[%s2542_s2 + $0x2dc] ss:$24 sps:$4 sm:$0xff]  }
  0x16   :  { %v1768_v63 = vld [vmem:[%s2542_s2 + $0x2d0] ss:$24 sps:$4 sm:$0xff]  }
  0x17   :  { %628 = vmatpush1.bf16.msra.mxu0 %v1708_v21  ;;  %v1774_v1 = vld [vmem:[%s2542_s2 + $0x2d8] ss:$24 sps:$4 sm:$0xff]  }
  0x18   :  { %629 = vmatprep.subr.bf16.mxu0 %v1710_v23  ;;  %669 = vmatpush1.bf16.msra.mxu1 %v1715_v25 }
  0x19   :  { %670 = vmatprep.subr.bf16.mxu1 %v1718_v26 }
  0x1b   :  { %630 = vmatpush1.bf16.msra.mxu0 %v1714_v24 }
  0x1c   :  { %631 = vmatprep.subr.bf16.mxu0 %v1716_v27  ;;  %671 = vmatpush1.bf16.msra.mxu1 %v1721_v28 }
  0x1d   :  { %672 = vmatprep.subr.bf16.mxu1 %v1724_v30 }
  0x1f   :  { %632 = vmatpush1.bf16.msra.mxu0 %v1720_v29 }
  0x20   :  { %633 = vmatprep.subr.bf16.mxu0 %v1722_v31  ;;  %673 = vmatpush1.bf16.msra.mxu1 %v1727_v33 }
  0x21   :  { %674 = vmatprep.subr.bf16.mxu1 %v1730_v34 }
  0x23   :  { %634 = vmatpush1.bf16.msra.mxu0 %v1726_v32 }
  0x24   :  { %635 = vmatprep.subr.bf16.mxu0 %v1728_v35  ;;  %675 = vmatpush1.bf16.msra.mxu1 %v1733_v36 }
  0x25   :  { %676 = vmatprep.subr.bf16.mxu1 %v1736_v38 }
  0x27   :  { %636 = vmatpush1.bf16.msra.mxu0 %v1732_v37 }
  0x28   :  { %637 = vmatprep.subr.bf16.mxu0 %v1734_v39  ;;  %677 = vmatpush1.bf16.msra.mxu1 %v1739_v41 }
  0x29   :  { %678 = vmatprep.subr.bf16.mxu1 %v1742_v42 }
  0x2b   :  { %638 = vmatpush1.bf16.msra.mxu0 %v1738_v40 }
  0x2c   :  { %639 = vmatprep.subr.bf16.mxu0 %v1740_v43  ;;  %679 = vmatpush1.bf16.msra.mxu1 %v1745_v45 }
  0x2d   :  { %680 = vmatprep.subr.bf16.mxu1 %v1748_v48 }
  0x2f   :  { %640 = vmatpush1.bf16.msra.mxu0 %v1744_v44 }
  0x30   :  { %641 = vmatprep.subr.bf16.mxu0 %v1746_v47  ;;  %681 = vmatpush1.bf16.msra.mxu1 %v1751_v50 }
  0x31   :  { %682 = vmatprep.subr.bf16.mxu1 %v1754_v52 }
  0x33   :  { %642 = vmatpush1.bf16.msra.mxu0 %v1750_v51 }
  0x34   :  { %643 = vmatprep.subr.bf16.mxu0 %v1752_v53  ;;  %683 = vmatpush1.bf16.msra.mxu1 %v1757_v54 }
  0x35   :  { %684 = vmatprep.subr.bf16.mxu1 %v1760_v56 }
  0x37   :  { %644 = vmatpush1.bf16.msra.mxu0 %v1756_v55 }
  0x38   :  { %645 = vmatprep.subr.bf16.mxu0 %v1758_v57  ;;  %685 = vmatpush1.bf16.msra.mxu1 %v1763_v58 }
  0x39   :  { %686 = vmatprep.subr.bf16.mxu1 %v1766_v60 }
  0x3b   :  { %646 = vmatpush1.bf16.msra.mxu0 %v1762_v59 }
  0x3c   :  { %647 = vmatprep.subr.bf16.mxu0 %v1764_v61  ;;  %687 = vmatpush1.bf16.msra.mxu1 %v1769_v62 }
  0x3d   :  { %688 = vmatprep.subr.bf16.mxu1 %v1772_v0 }
  0x3f   :  { %648 = vmatpush1.bf16.msra.mxu0 %v1768_v63 }
  0x40   :  { %689 = vmatpush1.bf16.msra.mxu1 %v1774_v1 }
  0x42   :  { %650 = vmatmul.mubr.bf16.vlgmr.msra.gmra.mrb[0].mxu0 %v2202_v2 }
  0x43   :  { %731 = vmatprep.mubr.bf16.mxu0 %v1512_v49  ;;  %691 = vmatmul.mubr.bf16.vlgmr.msra.gmra.mrb[0].mxu1 %v2202_v2 }
  0x44   :  { %13 = vsyncpa [#allocation4], 0  ;;  %v1775_v15 = vld [vmem:[%s2542_s2 + $0x10] ss:$24 sps:$4 sm:$0xff]   ;;  %v1777_v16 = vld [vmem:[%s2542_s2 + $0x14] ss:$24 sps:$4 sm:$0xff]  }
  0x45   :  { %v1780_v17 = vld [vmem:[%s2542_s2 + $0x44] ss:$24 sps:$4 sm:$0xff]   ;;  %699 = vmatprep.subr.bf16.mxu0 %v1777_v16  ;;  %v1778_v18 = vld [vmem:[%s2542_s2 + $0x40] ss:$24 sps:$4 sm:$0xff]   ;;  %v1783_v19 = vld [vmem:[%s2542_s2 + $0x74] ss:$24 sps:$4 sm:$0xff]  }
  0x46   :  { %700 = vmatpush1.bf16.msra.mxu0 %v1775_v15  ;;  %v1781_v20 = vld [vmem:[%s2542_s2 + $0x70] ss:$24 sps:$4 sm:$0xff]   ;;  %v1786_v21 = vld [vmem:[%s2542_s2 + $0xa4] ss:$24 sps:$4 sm:$0xff]   ;;  %v1784_v22 = vld [vmem:[%s2542_s2 + $0xa0] ss:$24 sps:$4 sm:$0xff]  }
  0x47   :  { %701 = vmatprep.subr.bf16.mxu0 %v1780_v17  ;;  %v785_v24 = vld [vmem:[%s2541_s1] sm:$0xff]  ;;  %vm787_vm0 = vcmask 64512   ;;  %v1787_v31 = vld [vmem:[%s2542_s2 + $0xd0] ss:$24 sps:$4 sm:$0xff]   ;;  %v1789_v32 = vld [vmem:[%s2542_s2 + $0xd4] ss:$24 sps:$4 sm:$0xff]  }
  0x48   :  { %v1792_v33 = vld [vmem:[%s2542_s2 + $0x104] ss:$24 sps:$4 sm:$0xff]   ;;  %v1790_v34 = vld [vmem:[%s2542_s2 + $0x100] ss:$24 sps:$4 sm:$0xff]   ;;  %v1795_v35 = vld [vmem:[%s2542_s2 + $0x134] ss:$24 sps:$4 sm:$0xff]  }
  0x49   :  { %v1793_v36 = vld [vmem:[%s2542_s2 + $0x130] ss:$24 sps:$4 sm:$0xff]   ;;  %v1798_v37 = vld [vmem:[%s2542_s2 + $0x164] ss:$24 sps:$4 sm:$0xff]   ;;  %v1796_v38 = vld [vmem:[%s2542_s2 + $0x160] ss:$24 sps:$4 sm:$0xff]  }
  0x4a   :  { %702 = vmatpush1.bf16.msra.mxu0 %v1778_v18  ;;  %v1801_v39 = vld [vmem:[%s2542_s2 + $0x194] ss:$24 sps:$4 sm:$0xff]   ;;  %v1799_v40 = vld [vmem:[%s2542_s2 + $0x190] ss:$24 sps:$4 sm:$0xff]   ;;  %v1804_v41 = vld [vmem:[%s2542_s2 + $0x1c4] ss:$24 sps:$4 sm:$0xff]  }
  0x4b   :  { %703 = vmatprep.subr.bf16.mxu0 %v1783_v19  ;;  %v1802_v42 = vld [vmem:[%s2542_s2 + $0x1c0] ss:$24 sps:$4 sm:$0xff]   ;;  %v1807_v43 = vld [vmem:[%s2542_s2 + $0x1f4] ss:$24 sps:$4 sm:$0xff]   ;;  %v1805_v44 = vld [vmem:[%s2542_s2 + $0x1f0] ss:$24 sps:$4 sm:$0xff]  }
  0x4c   :  { %v1810_v45 = vld [vmem:[%s2542_s2 + $0x224] ss:$24 sps:$4 sm:$0xff]   ;;  %v1808_v47 = vld [vmem:[%s2542_s2 + $0x220] ss:$24 sps:$4 sm:$0xff]   ;;  %v1813_v48 = vld [vmem:[%s2542_s2 + $0x254] ss:$24 sps:$4 sm:$0xff]  }
  0x4d   :  { %v1811_v49 = vld [vmem:[%s2542_s2 + $0x250] ss:$24 sps:$4 sm:$0xff]   ;;  %v1816_v50 = vld [vmem:[%s2542_s2 + $0x284] ss:$24 sps:$4 sm:$0xff]   ;;  %v1814_v51 = vld [vmem:[%s2542_s2 + $0x280] ss:$24 sps:$4 sm:$0xff]  }
  0x4e   :  { %704 = vmatpush1.bf16.msra.mxu0 %v1781_v20  ;;  %v1819_v52 = vld [vmem:[%s2542_s2 + $0x2b4] ss:$24 sps:$4 sm:$0xff]   ;;  %v1817_v53 = vld [vmem:[%s2542_s2 + $0x2b0] ss:$24 sps:$4 sm:$0xff]   ;;  %v1822_v54 = vld [vmem:[%s2542_s2 + $0x2e4] ss:$24 sps:$4 sm:$0xff]  }
  0x4f   :  { %705 = vmatprep.subr.bf16.mxu0 %v1786_v21  ;;  %v1820_v55 = vld [vmem:[%s2542_s2 + $0x2e0] ss:$24 sps:$4 sm:$0xff]   ;;  %v1959_v61 = vmov 0   ;;  %vm821_vm1 = vcmask 1043456   ;;  %v1834_v16 = vld [vmem:[%s2543_s3 + $0x34] ss:$8 sps:$4 sm:$0xff]  }
  0x50   :  { %v1829_v15 = vld [vmem:[%s2543_s3 + $0x20] ss:$8 sps:$4 sm:$0xff]   ;;  %v1832_v17 = vld [vmem:[%s2543_s3 + $0x30] ss:$8 sps:$4 sm:$0xff]   ;;  %v1837_v18 = vld [vmem:[%s2543_s3 + $0x44] ss:$8 sps:$4 sm:$0xff]  }
  0x51   :  { %v1835_v19 = vld [vmem:[%s2543_s3 + $0x40] ss:$8 sps:$4 sm:$0xff]   ;;  %v1840_v20 = vld [vmem:[%s2543_s3 + $0x54] ss:$8 sps:$4 sm:$0xff]   ;;  %v1838_v21 = vld [vmem:[%s2543_s3 + $0x50] ss:$8 sps:$4 sm:$0xff]  }
  0x52   :  { %706 = vmatpush1.bf16.msra.mxu0 %v1784_v22  ;;  %v1843_v22 = vld [vmem:[%s2543_s3 + $0x64] ss:$8 sps:$4 sm:$0xff]   ;;  %s1960_s29 = smov [#allocation3]   ;;  %vm1495_vm6 = vcmask 57344  }
  0x53   :  { %707 = vmatprep.subr.bf16.mxu0 %v1789_v32  ;;  %v1858_v32 = vld [vmem:[%s2543_s3 + $0xb4] ss:$8 sps:$4 sm:$0xff]   ;;  %s1503_s2 = sshll.u32 %s1960_s29, 4  ;;  %s1504_s2 = int_to_ptr.vmem [resolvable:$true] %s1503_s2 }
  0x54   :  { %s1935_s30 = scalar_lea.vmem %s1504_s2, 16  ;;  %p1940_p1 = scmp.lt.s32.totalorder %s1504_s2, %s1504_s2 }
  0x55   :  { %p1936_p0 = scmp.ne.s32.totalorder %s1504_s2, %s1935_s30 }
  0x56   :  { %708 = vmatpush1.bf16.msra.mxu0 %v1787_v31  ;;  %v1853_v31 = vld [vmem:[%s2543_s3 + $0xa0] ss:$8 sps:$4 sm:$0xff]  }
  0x57   :  { %709 = vmatprep.subr.bf16.mxu0 %v1792_v33  ;;  %v1856_v33 = vld [vmem:[%s2543_s3 + $0xb0] ss:$8 sps:$4 sm:$0xff]  }
  0x5a   :  { %710 = vmatpush1.bf16.msra.mxu0 %v1790_v34  ;;  %v1861_v34 = vld [vmem:[%s2543_s3 + $0xc4] ss:$8 sps:$4 sm:$0xff]  }
  0x5b   :  { %711 = vmatprep.subr.bf16.mxu0 %v1795_v35  ;;  %v1859_v35 = vld [vmem:[%s2543_s3 + $0xc0] ss:$8 sps:$4 sm:$0xff]  }
  0x5e   :  { %712 = vmatpush1.bf16.msra.mxu0 %v1793_v36  ;;  %v1864_v36 = vld [vmem:[%s2543_s3 + $0xd4] ss:$8 sps:$4 sm:$0xff]  }
  0x5f   :  { %713 = vmatprep.subr.bf16.mxu0 %v1798_v37  ;;  %v1862_v37 = vld [vmem:[%s2543_s3 + $0xd0] ss:$8 sps:$4 sm:$0xff]  }
  0x62   :  { %714 = vmatpush1.bf16.msra.mxu0 %v1796_v38  ;;  %v1867_v38 = vld [vmem:[%s2543_s3 + $0xe4] ss:$8 sps:$4 sm:$0xff]  }
  0x63   :  { %715 = vmatprep.subr.bf16.mxu0 %v1801_v39  ;;  %v1865_v39 = vld [vmem:[%s2543_s3 + $0xe0] ss:$8 sps:$4 sm:$0xff]  }
  0x66   :  { %716 = vmatpush1.bf16.msra.mxu0 %v1799_v40  ;;  %v1870_v40 = vld [vmem:[%s2543_s3 + $0xf4] ss:$8 sps:$4 sm:$0xff]  }
  0x67   :  { %717 = vmatprep.subr.bf16.mxu0 %v1804_v41  ;;  %v1868_v41 = vld [vmem:[%s2543_s3 + $0xf0] ss:$8 sps:$4 sm:$0xff]  }
  0x6a   :  { %718 = vmatpush1.bf16.msra.mxu0 %v1802_v42 }
  0x6b   :  { %719 = vmatprep.subr.bf16.mxu0 %v1807_v43 }
  0x6e   :  { %720 = vmatpush1.bf16.msra.mxu0 %v1805_v44 }
  0x6f   :  { %721 = vmatprep.subr.bf16.mxu0 %v1810_v45 }
  0x72   :  { %722 = vmatpush1.bf16.msra.mxu0 %v1808_v47 }
  0x73   :  { %723 = vmatprep.subr.bf16.mxu0 %v1813_v48 }
  0x76   :  { %724 = vmatpush1.bf16.msra.mxu0 %v1811_v49  ;;  %v30_v49 = vunpack.c.l.bf16 %v2142_v46 }
  0x77   :  { %725 = vmatprep.subr.bf16.mxu0 %v1816_v50  ;;  %v31_v50 = vunpack.c.h.bf16 %v2142_v46  ;;  %v1876_v46 = vld [vmem:[%s2544_s4 + $0x14] ss:$8 sps:$4 sm:$0xff]  }
  0x7a   :  { %726 = vmatpush1.bf16.msra.mxu0 %v1814_v51 }
  0x7b   :  { %727 = vmatprep.subr.bf16.mxu0 %v1819_v52 }
  0x7e   :  { %728 = vmatpush1.bf16.msra.mxu0 %v1817_v53 }
  0x7f   :  { %729 = vmatprep.subr.bf16.mxu0 %v1822_v54 }
  0x82   :  { %730 = vmatpush1.bf16.msra.mxu0 %v1820_v55 }
  0x85   :  { %732 = vmatmul.mubr.bf16.vlgmr.msra.gmra.mrb[4].mxu0 %v2202_v2  ;;  %v1825_v2 = vld [vmem:[%s2543_s3 + $0x4] ss:$8 sps:$4 sm:$0xff]  }
 0x115   :  { %v651_v3 = vpop.f32.mrb[0].mxu0 }
 0x116   :  { %v653_v4 = vpop.f32.mrb[1].mxu0  ;;  %v742_v7 = vpack.c.bf16 %v651_v3, %v651_v3  ;;  %v692_v9 = vpop.f32.mrb[0].mxu1 }
 0x117   :  { %v743_v5 = vpack.c.bf16 %v653_v4, %v653_v4  ;;  %v655_v6 = vpop.f32.mrb[2].mxu0  ;;  %v694_v10 = vpop.f32.mrb[1].mxu1  ;;  %v740_v14 = vpack.c.bf16 %v692_v9, %v692_v9 }
 0x118   :  { %v656_v8 = vpop.f32.mrb[3].mxu0  ;;  %v741_v11 = vpack.c.bf16 %v694_v10, %v694_v10  ;;  %v696_v12 = vpop.f32.mrb[2].mxu1  ;;  %v1823_v10 = vld [vmem:[%s2543_s3] ss:$8 sps:$4 sm:$0xff]  }
 0x119   :  { %744 = vmatprep.subr.bf16.mxu1 %v743_v5  ;;  %v697_v13 = vpop.f32.mrb[3].mxu1 }
 0x11a   :  { %745 = vmatpush1.bf16.xpose.msra.mxu1 %v742_v7  ;;  %776 = vmatprep.mubr.bf16.mxu1 %v741_v11  ;;  %v1828_v11 = vld [vmem:[%s2543_s3 + $0x14] ss:$8 sps:$4 sm:$0xff]   ;;  %v1826_v13 = vld [vmem:[%s2543_s3 + $0x10] ss:$8 sps:$4 sm:$0xff]  }
 0x121   :  { %777 = vmatmul.mubr.bf16.vlgmr.msra.gmra.mrb[4].mxu1 %v740_v14  ;;  %v1831_v14 = vld [vmem:[%s2543_s3 + $0x24] ss:$8 sps:$4 sm:$0xff]  }
 0x122   :  { %860 = vmatprep.mubr.bf16.mxu1 %v1959_v61  ;;  %v1879_v61 = vld [vmem:[%s2544_s4 + $0x24] ss:$8 sps:$4 sm:$0xff]  }
 0x158   :  { %v733_v62 = vpop.f32.mrb[4].mxu0 }
 0x159   :  { %v800_v63 = vpack.c.bf16 %v733_v62, %v733_v62  ;;  %v735_v0 = vpop.f32.mrb[5].mxu0  ;;  %v1877_v62 = vld [vmem:[%s2544_s4 + $0x20] ss:$8 sps:$4 sm:$0xff]  }
 0x15a   :  { %v801_v1 = vpack.c.bf16 %v735_v0, %v735_v0  ;;  %v737_v3 = vpop.f32.mrb[6].mxu0  ;;  %v1880_v0 = vld [vmem:[%s2544_s4 + $0x30] ss:$8 sps:$4 sm:$0xff]  }
 0x15b   :  { %v823_v4 = vsel %vm821_vm1, %v800_v63, 0  ;;  %v738_v5 = vpop.f32.mrb[7].mxu0  ;;  %v1882_v63 = vld [vmem:[%s2544_s4 + $0x34] ss:$8 sps:$4 sm:$0xff]   ;;  %v1883_v3 = vld [vmem:[%s2544_s4 + $0x40] ss:$8 sps:$4 sm:$0xff]  }
 0x15c   :  { %1609 = vmatprep.subr.msk.bf16.mxu1 %vm821_vm1, %v801_v1  ;;  %v1885_v1 = vld [vmem:[%s2544_s4 + $0x44] ss:$8 sps:$4 sm:$0xff]   ;;  %v1886_v5 = vld [vmem:[%s2544_s4 + $0x50] ss:$8 sps:$4 sm:$0xff]  }
 0x15d   :  { %829 = vmatpush1.bf16.msra.mxu1 %v823_v4  ;;  %v1888_v4 = vld [vmem:[%s2544_s4 + $0x54] ss:$8 sps:$4 sm:$0xff]  }
 0x15e   :  { %1063 = vmatprep.subr.bf16.mxu1 %v1825_v2  ;;  %v1891_v2 = vld [vmem:[%s2544_s4 + $0x64] ss:$8 sps:$4 sm:$0xff]  }
 0x1f4   :  { %v778_v23 = vpop.f32.mrb[4].mxu1 }
 0x1f5   :  { %v784_v25 = vmul.f32 0.06, %v778_v23  ;;  %v780_v26 = vpop.f32.mrb[5].mxu1  ;;  %v1841_v23 = vld [vmem:[%s2543_s3 + $0x60] ss:$8 sps:$4 sm:$0xff]  }
 0x1f6   :  { %v781_v27 = vpop.f32.mrb[6].mxu1  ;;  %v1849_v26 = vld [vmem:[%s2543_s3 + $0x84] ss:$8 sps:$4 sm:$0xff]  }
 0x1f7   :  { %v782_v28 = vpop.f32.mrb[7].mxu1  ;;  %v786_v29 = vadd.f32 %v785_v24, %v784_v25  ;;  %v1846_v24 = vld [vmem:[%s2543_s3 + $0x74] ss:$8 sps:$4 sm:$0xff]   ;;  %v1844_v25 = vld [vmem:[%s2543_s3 + $0x70] ss:$8 sps:$4 sm:$0xff]  }
 0x1f8   :  { %v1847_v27 = vld [vmem:[%s2543_s3 + $0x80] ss:$8 sps:$4 sm:$0xff]   ;;  %v1852_v28 = vld [vmem:[%s2543_s3 + $0x94] ss:$8 sps:$4 sm:$0xff]  }
 0x1f9   :  { %v788_v30 = vsel %vm787_vm0, %v786_v29, -inf }
 0x1fa   :  { %789 = vmax.xlane.f32.xlu0 %v788_v30  ;;  %v1855_v30 = vld [vmem:[%s2543_s3 + $0xa4] ss:$8 sps:$4 sm:$0xff]  }
 0x287   :  { %v790_v56 = vpop.xlane.xlu0 %789 }
 0x288   :  { %v791_v57 = vsub.f32 %v786_v29, %v790_v56  ;;  %v1850_v29 = vld [vmem:[%s2543_s3 + $0x90] ss:$8 sps:$4 sm:$0xff]  }
 0x28a   :  { %v792_v58 = vmul.f32 1.442695, %v791_v57 }
 0x28c   :  { %1919 = vpow2.f32 %v792_v58  ;;  %v1871_v58 = vld [vmem:[%s2544_s4] ss:$8 sps:$4 sm:$0xff]  }
 0x296   :  { %v1920_v59 = vpop.eup %1919 }
 0x297   :  { %v794_v60 = vsel %vm787_vm0, %v1920_v59, 0.0 }
 0x298   :  { %795 = vadd.xlane.f32.xlu0 %v794_v60  ;;  %v1874_v60 = vld [vmem:[%s2544_s4 + $0x10] ss:$8 sps:$4 sm:$0xff]  }
 0x325   :  { %v796_v6 = vpop.xlane.xlu0 %795 }
 0x326   :  { %1921 = vrcp.f32 %v796_v6  ;;  %v1889_v6 = vld [vmem:[%s2544_s4 + $0x60] ss:$8 sps:$4 sm:$0xff]  }
 0x330   :  { %v1922_v7 = vpop.eup %1921 }
 0x331   :  { %v798_v8 = vmul.f32 %v1922_v7, %v1920_v59  ;;  %v1873_v59 = vld [vmem:[%s2544_s4 + $0x4] ss:$8 sps:$4 sm:$0xff]  }
 0x332   :  { %1350 = vmatprep.subr.bf16.mxu0 %v1873_v59 }
 0x333   :  { %v799_v9 = vpack.c.bf16 %v798_v8, %v798_v8  ;;  %1351 = vmatpush1.bf16.msra.mxu0 %v1871_v58 }
 0x334   :  { %1352 = vmatprep.subr.bf16.mxu0 %v1876_v46 }
 0x335   :  { %802 = vxpose.xlu1.c.b16.start.end [1/1] (short) (narrow) %v799_v9, 16 }
 0x337   :  { %1353 = vmatpush1.bf16.msra.mxu0 %v1874_v60 }
 0x338   :  { %1354 = vmatprep.subr.bf16.mxu0 %v1879_v61 }
 0x33b   :  { %1355 = vmatpush1.bf16.msra.mxu0 %v1877_v62 }
 0x33c   :  { %1356 = vmatprep.subr.bf16.mxu0 %v1882_v63 }
 0x33f   :  { %1357 = vmatpush1.bf16.msra.mxu0 %v1880_v0 }
 0x340   :  { %1358 = vmatprep.subr.bf16.mxu0 %v1885_v1 }
 0x343   :  { %1359 = vmatpush1.bf16.msra.mxu0 %v1883_v3 }
 0x344   :  { %1360 = vmatprep.subr.bf16.mxu0 %v1888_v4 }
 0x347   :  { %1361 = vmatpush1.bf16.msra.mxu0 %v1886_v5 }
 0x348   :  { %1362 = vmatprep.subr.bf16.mxu0 %v1891_v2 }
 0x34b   :  { %1363 = vmatpush1.bf16.msra.mxu0 %v1889_v6 }
 0x39b   :  { %v810_v12 = vpop.trf.xlu1 }
 0x39c   :  { %1610 = vmatmul.mubr.msk.bf16.vlgmr.msra.gmra.mrb[8].mxu1 %vm787_vm0, %v810_v12 }
 0x39d   :  { %1064 = vmatpush1.bf16.msra.mxu1 %v1823_v10 }
 0x39e   :  { %1065 = vmatprep.subr.bf16.mxu1 %v1828_v11 }
 0x3a1   :  { %1066 = vmatpush1.bf16.msra.mxu1 %v1826_v13 }
 0x3a2   :  { %1067 = vmatprep.subr.bf16.mxu1 %v1831_v14  ;;  %v1894_v14 = vld [vmem:[%s2544_s4 + $0x74] ss:$8 sps:$4 sm:$0xff]  }
 0x3a3   :  { %1364 = vmatprep.subr.bf16.mxu0 %v1894_v14 }
 0x3a5   :  { %1068 = vmatpush1.bf16.msra.mxu1 %v1829_v15  ;;  %v1892_v15 = vld [vmem:[%s2544_s4 + $0x70] ss:$8 sps:$4 sm:$0xff]  }
 0x3a6   :  { %1069 = vmatprep.subr.bf16.mxu1 %v1834_v16  ;;  %1365 = vmatpush1.bf16.msra.mxu0 %v1892_v15  ;;  %v1897_v16 = vld [vmem:[%s2544_s4 + $0x84] ss:$8 sps:$4 sm:$0xff]  }
 0x3a7   :  { %1366 = vmatprep.subr.bf16.mxu0 %v1897_v16 }
 0x3a9   :  { %1070 = vmatpush1.bf16.msra.mxu1 %v1832_v17  ;;  %v1895_v17 = vld [vmem:[%s2544_s4 + $0x80] ss:$8 sps:$4 sm:$0xff]  }
 0x3aa   :  { %1071 = vmatprep.subr.bf16.mxu1 %v1837_v18  ;;  %1367 = vmatpush1.bf16.msra.mxu0 %v1895_v17  ;;  %v1900_v18 = vld [vmem:[%s2544_s4 + $0x94] ss:$8 sps:$4 sm:$0xff]  }
 0x3ab   :  { %1368 = vmatprep.subr.bf16.mxu0 %v1900_v18 }
 0x3ad   :  { %1072 = vmatpush1.bf16.msra.mxu1 %v1835_v19  ;;  %v1898_v19 = vld [vmem:[%s2544_s4 + $0x90] ss:$8 sps:$4 sm:$0xff]  }
 0x3ae   :  { %1073 = vmatprep.subr.bf16.mxu1 %v1840_v20  ;;  %1369 = vmatpush1.bf16.msra.mxu0 %v1898_v19  ;;  %v1903_v20 = vld [vmem:[%s2544_s4 + $0xa4] ss:$8 sps:$4 sm:$0xff]  }
 0x3af   :  { %1370 = vmatprep.subr.bf16.mxu0 %v1903_v20 }
 0x3b1   :  { %1074 = vmatpush1.bf16.msra.mxu1 %v1838_v21  ;;  %v1901_v21 = vld [vmem:[%s2544_s4 + $0xa0] ss:$8 sps:$4 sm:$0xff]  }
 0x3b2   :  { %1075 = vmatprep.subr.bf16.mxu1 %v1843_v22  ;;  %1371 = vmatpush1.bf16.msra.mxu0 %v1901_v21  ;;  %v1904_v22 = vld [vmem:[%s2544_s4 + $0xb0] ss:$8 sps:$4 sm:$0xff]  }
 0x3b5   :  { %1076 = vmatpush1.bf16.msra.mxu1 %v1841_v23  ;;  %v1906_v23 = vld [vmem:[%s2544_s4 + $0xb4] ss:$8 sps:$4 sm:$0xff]  }
 0x3b6   :  { %1077 = vmatprep.subr.bf16.mxu1 %v1846_v24  ;;  %v1909_v24 = vld [vmem:[%s2544_s4 + $0xc4] ss:$8 sps:$4 sm:$0xff]   ;;  %1372 = vmatprep.subr.bf16.mxu0 %v1906_v23 }
 0x3b7   :  { %1373 = vmatpush1.bf16.msra.mxu0 %v1904_v22 }
 0x3b8   :  { %1374 = vmatprep.subr.bf16.mxu0 %v1909_v24 }
 0x3b9   :  { %1078 = vmatpush1.bf16.msra.mxu1 %v1844_v25  ;;  %v1907_v25 = vld [vmem:[%s2544_s4 + $0xc0] ss:$8 sps:$4 sm:$0xff]  }
 0x3ba   :  { %1079 = vmatprep.subr.bf16.mxu1 %v1849_v26  ;;  %v1912_v26 = vld [vmem:[%s2544_s4 + $0xd4] ss:$8 sps:$4 sm:$0xff]  }
 0x3bb   :  { %1375 = vmatpush1.bf16.msra.mxu0 %v1907_v25 }
 0x3bc   :  { %1376 = vmatprep.subr.bf16.mxu0 %v1912_v26 }
 0x3bd   :  { %1080 = vmatpush1.bf16.msra.mxu1 %v1847_v27  ;;  %v1910_v27 = vld [vmem:[%s2544_s4 + $0xd0] ss:$8 sps:$4 sm:$0xff]  }
 0x3be   :  { %1081 = vmatprep.subr.bf16.mxu1 %v1852_v28  ;;  %v1915_v28 = vld [vmem:[%s2544_s4 + $0xe4] ss:$8 sps:$4 sm:$0xff]  }
 0x3bf   :  { %1377 = vmatpush1.bf16.msra.mxu0 %v1910_v27 }
 0x3c0   :  { %1378 = vmatprep.subr.bf16.mxu0 %v1915_v28 }
 0x3c1   :  { %1082 = vmatpush1.bf16.msra.mxu1 %v1850_v29  ;;  %v1913_v29 = vld [vmem:[%s2544_s4 + $0xe0] ss:$8 sps:$4 sm:$0xff]  }
 0x3c2   :  { %1083 = vmatprep.subr.bf16.mxu1 %v1855_v30  ;;  %v1918_v30 = vld [vmem:[%s2544_s4 + $0xf4] ss:$8 sps:$4 sm:$0xff]  }
 0x3c3   :  { %1379 = vmatpush1.bf16.msra.mxu0 %v1913_v29 }
 0x3c4   :  { %1380 = vmatprep.subr.bf16.mxu0 %v1918_v30 }
 0x3c5   :  { %1084 = vmatpush1.bf16.msra.mxu1 %v1853_v31  ;;  %v1916_v31 = vld [vmem:[%s2544_s4 + $0xf0] ss:$8 sps:$4 sm:$0xff]  }
 0x3c6   :  { %1085 = vmatprep.subr.bf16.mxu1 %v1858_v32 }
 0x3c7   :  { %1381 = vmatpush1.bf16.msra.mxu0 %v1916_v31 }
 0x3c9   :  { %1086 = vmatpush1.bf16.msra.mxu1 %v1856_v33 }
 0x3ca   :  { %1087 = vmatprep.subr.bf16.mxu1 %v1861_v34 }
 0x3cd   :  { %1088 = vmatpush1.bf16.msra.mxu1 %v1859_v35  ;;  %v1126_v35 = vlaneseq }
 0x3ce   :  { %1089 = vmatprep.subr.bf16.mxu1 %v1864_v36 }
 0x3d1   :  { %1090 = vmatpush1.bf16.msra.mxu1 %v1862_v37 }
 0x3d2   :  { %1091 = vmatprep.subr.bf16.mxu1 %v1867_v38 }
 0x3d5   :  { %1092 = vmatpush1.bf16.msra.mxu1 %v1865_v39  ;;  %v2503_v39 = vshrl.u32 %v1126_v35, 7 }
 0x3d6   :  { %1093 = vmatprep.subr.bf16.mxu1 %v1870_v40 }
 0x3d7   :  { %v1184_v46 = vsub.s32 0, %v2503_v39  ;;  %v1416_v24 = vsub.s32 4, %v2503_v39  ;;  %v1428_v27 = vsub.s32 5, %v2503_v39 }
 0x3d9   :  { %1094 = vmatpush1.bf16.msra.mxu1 %v1868_v41 }
 0x46f   :  { %v862_v42 = vpop.f32.mrb[8].mxu1 }
 0x470   :  { %v864_v43 = vpop.f32.mrb[9].mxu1  ;;  %v869_v47 = vpack.c.bf16 %v862_v42, %v862_v42  ;;  %v1128_v42 = vsub.s32 2, %v2503_v39 }
 0x471   :  { %v870_v44 = vpack.c.bf16 %v864_v43, %v864_v43  ;;  %v866_v45 = vpop.f32.mrb[10].mxu1  ;;  %v2509_v43 = vld [vmem:[%s2545_s5] sm:$0xff] }
 0x472   :  { %v867_v48 = vpop.f32.mrb[11].mxu1  ;;  %v1129_v45 = vrot.slane %v2509_v43, %v1128_v42  ;;  %v1185_v60 = vrot.slane %v2509_v43, %v1184_v46  ;;  %v1417_v25 = vrot.slane %v2509_v43, %v1416_v24  ;;  %v1429_v31 = vrot.slane %v2509_v43, %v1428_v27 }
 0x473   :  { %1095 = vmatprep.mubr.bf16.mxu1 %v870_v44  ;;  %v33_v44 = vld [vmem:[%s2545_s5 + $0x8] sm:$0xff]  ;;  %v1140_v48 = vsub.s32 3, %v2503_v39  ;;  %v1441_v39 = vstv %s2546_s6  ;;  %s1939_s6 = scalar_lea.vmem %s1504_s2, 32 }
 0x474   :  { %1096 = vmatmul.mubr.bf16.vlgmr.msra.gmra.mrb[12].mxu1 %v869_v47  ;;  %v1133_v47 = vrot.slane %v33_v44, %v1128_v42  ;;  %v1189_v61 = vrot.slane %v33_v44, %v1184_v46  ;;  %v1437_v14 = vpack.c.bf16 %v33_v44, %v33_v44  ;;  %v1421_v26 = vrot.slane %v33_v44, %v1416_v24  ;;  %p1941_p2 = scmp.lt.s32.totalorder %s1939_s6, %s1935_s30 }
 0x475   :  { %v1433_v30 = vrot.slane %v33_v44, %v1428_v27 }
 0x476   :  { %v1446_v15 = vshrl.u32 %v1437_v14, 16  ;;  %p1942_p3 = por %p1941_p2, %p1940_p1 }
 0x478   :  { %1482 = vmatprep.mubr.bf16.mxu1 %v1446_v15  ;;  %p1943_p4 = pnand %p1942_p3, %p1936_p0 }
 0x547   :  { %v1097_v51 = vpop.f32.mrb[12].mxu1 }
 0x548   :  { %v1098_v52 = vadd.f32 %v1097_v51, %v30_v49  ;;  %v1099_v53 = vpop.f32.mrb[13].mxu1  ;;  %v1145_v51 = vrot.slane %v33_v44, %v1140_v48 }
 0x549   :  { %v1100_v54 = vadd.f32 %v1099_v53, %v31_v50  ;;  %v1101_v55 = vpop.f32.mrb[14].mxu1 }
 0x54a   :  { %v1102_v56 = vpop.f32.mrb[15].mxu1 }
 0x54b   :  { %v1104_v57 = vadd.f32 %v1100_v54, %v1098_v52 }
 0x54d   :  { %1105 = vadd.xlane.f32.xlu1 %v1104_v57 }
 0x5da   :  { %v1106_v7 = vpop.xlane.xlu1 %1105 }
 0x5db   :  { %v1108_v8 = vmul.f32 0.00390625, %v1106_v7 }
 0x5dd   :  { %v1109_v9 = vsub.f32 %v1098_v52, %v1108_v8  ;;  %v1110_v10 = vsub.f32 %v1100_v54, %v1108_v8  ;;  %v1141_v52 = vrot.slane %v2509_v43, %v1140_v48 }
 0x5df   :  { %v1111_v11 = vmul.f32 %v1109_v9, %v1109_v9  ;;  %v1112_v12 = vmul.f32 %v1110_v10, %v1110_v10  ;;  %v1134_v49 = vmul.f32 %v1129_v45, %v1109_v9  ;;  %v1135_v50 = vmul.f32 %v1133_v47, %v1110_v10 }
 0x5e1   :  { %v1113_v13 = vadd.f32 %v1112_v12, %v1111_v11 }
 0x5e3   :  { %1114 = vadd.xlane.f32.xlu0 %v1113_v13 }
 0x670   :  { %v1115_v32 = vpop.xlane.xlu0 %1114 }
 0x671   :  { %v1116_v33 = vmul.f32 0.003921569, %v1115_v32 }
 0x673   :  { %1923 = vrsqrt.f32 %v1116_v33  ;;  %vm1119_vm2 = vcmp.eq.f32.partialorder %v1116_v33, inf  ;;  %v1122_v37 = vand.u32 2147483648, %v1116_v33  ;;  %vm1121_vm3 = vcmp.eq.f32.partialorder %v1116_v33, 0.0 }
 0x67d   :  { %v1924_v34 = vpop.eup %1923 }
 0x67e   :  { %v1118_v36 = vmul.f32 %v1924_v34, %v1116_v33 }
 0x680   :  { %v1120_v38 = vsel %vm1119_vm2, %v1116_v33, %v1118_v36 }
 0x681   :  { %v1123_v40 = vsel %vm1121_vm3, %v1122_v37, %v1120_v38 }
 0x682   :  { %v1124_v41 = vadd.f32 1e-06, %v1123_v40  ;;  %v1436_v40 = vpack.c.bf16 %v2509_v43, %v2509_v43 }
 0x684   :  { %1925 = vrcp.f32 %v1124_v41  ;;  %v1443_v41 = vshrl.u32 %v1436_v40, 16 }
 0x68e   :  { %v1926_v53 = vpop.eup %1925 }
 0x68f   :  { %v1137_v54 = vmul.f32 %v1926_v53, %v1135_v50  ;;  %v1136_v55 = vmul.f32 %v1926_v53, %v1134_v49 }
 0x691   :  { %v1147_v56 = vadd.f32 %v1145_v51, %v1137_v54  ;;  %v1146_v57 = vadd.f32 %v1141_v52, %v1136_v55 }
 0x693   :  { %v1149_v58 = vpack.c.bf16 %v1147_v56, %v1147_v56  ;;  %v1148_v59 = vpack.c.bf16 %v1146_v57, %v1146_v57 }
 0x695   :  { %1382 = vmatprep.mubr.bf16.mxu0 %v1149_v58 }
 0x696   :  { %1383 = vmatmul.mubr.bf16.vlgmr.msra.gmra.mrb[8].mxu0 %v1148_v59 }
 0x769   :  { %v1384_v62 = vpop.f32.mrb[8].mxu0 }
 0x76a   :  { %v1385_v63 = vadd.f32 %v1384_v62, %v1185_v60  ;;  %v1386_v0 = vpop.f32.mrb[9].mxu0 }
 0x76b   :  { %v1387_v1 = vadd.f32 %v1386_v0, %v1189_v61  ;;  %v1388_v3 = vpop.f32.mrb[10].mxu0 }
 0x76c   :  { %v1391_v4 = vmax.f32 %v1385_v63, 0.0  ;;  %v1389_v5 = vpop.f32.mrb[11].mxu0 }
 0x76d   :  { %v1392_v2 = vmax.f32 %v1387_v1, 0.0 }
 0x76f   :  { %v1393_v6 = vadd.f32 %v1392_v2, %v1391_v4 }
 0x771   :  { %1394 = vadd.xlane.f32.xlu0 %v1393_v6 }
 0x7fe   :  { %v1395_v7 = vpop.xlane.xlu0 %1394 }
 0x7ff   :  { %v1396_v8 = vmul.f32 0.00390625, %v1395_v7 }
 0x801   :  { %v1397_v9 = vsub.f32 %v1391_v4, %v1396_v8  ;;  %v1398_v10 = vsub.f32 %v1392_v2, %v1396_v8 }
 0x803   :  { %v1399_v11 = vmul.f32 %v1397_v9, %v1397_v9  ;;  %v1400_v12 = vmul.f32 %v1398_v10, %v1398_v10  ;;  %v1422_v28 = vmul.f32 %v1417_v25, %v1397_v9  ;;  %v1423_v29 = vmul.f32 %v1421_v26, %v1398_v10 }
 0x805   :  { %v1401_v13 = vadd.f32 %v1400_v12, %v1399_v11 }
 0x807   :  { %1402 = vadd.xlane.f32.xlu0 %v1401_v13 }
 0x894   :  { %v1403_v16 = vpop.xlane.xlu0 %1402 }
 0x895   :  { %v1404_v17 = vmul.f32 0.003921569, %v1403_v16 }
 0x897   :  { %1927 = vrsqrt.f32 %v1404_v17  ;;  %vm1407_vm4 = vcmp.eq.f32.partialorder %v1404_v17, inf  ;;  %v1410_v20 = vand.u32 2147483648, %v1404_v17  ;;  %vm1409_vm5 = vcmp.eq.f32.partialorder %v1404_v17, 0.0 }
 0x8a1   :  { %v1928_v18 = vpop.eup %1927 }
 0x8a2   :  { %v1406_v19 = vmul.f32 %v1928_v18, %v1404_v17 }
 0x8a4   :  { %v1408_v21 = vsel %vm1407_vm4, %v1404_v17, %v1406_v19 }
 0x8a5   :  { %v1411_v22 = vsel %vm1409_vm5, %v1410_v20, %v1408_v21 }
 0x8a6   :  { %v1412_v23 = vadd.f32 1e-06, %v1411_v22 }
 0x8a8   :  { %1929 = vrcp.f32 %v1412_v23 }
 0x8b2   :  { %v1930_v32 = vpop.eup %1929 }
 0x8b3   :  { %v1425_v33 = vmul.f32 %v1930_v32, %v1423_v29  ;;  %v1424_v34 = vmul.f32 %v1930_v32, %v1422_v28 }
 0x8b5   :  { %v1435_v35 = vadd.f32 %v1433_v30, %v1425_v33  ;;  %v1434_v36 = vadd.f32 %v1429_v31, %v1424_v34 }
 0x8b7   :  { %v1439_v37 = vpack.c.bf16 %v1435_v35, %v1435_v35  ;;  %v1438_v38 = vpack.c.bf16 %v1434_v36, %v1434_v36 }
 0x8b9   :  { %1450 = vmatprep.subr.bf16.mxu1 %v1439_v37 }
 0x8ba   :  { %1451 = vmatpush1.bf16.xpose.msra.mxu1 %v1438_v38 }
 0x8c1   :  { %1483 = vmatmul.mubr.bf16.vlgmr.msra.gmra.mrb[16].mxu1 %v1443_v41 }
 0x994   :  { %v1484_v42 = vpop.f32.mrb[16].mxu1 }
 0x995   :  { %v1485_v44 = vadd.f32 %v1484_v42, %v1441_v39  ;;  %v1486_v45 = vpop.f32.mrb[17].mxu1 }
 0x996   :  { %v1487_v47 = vpop.f32.mrb[18].mxu1 }
 0x997   :  { %v1490_v48 = vsub.f32 0.0, %v1485_v44  ;;  %v1488_v49 = vpop.f32.mrb[19].mxu1 }
 0x999   :  { %v1491_v50 = vmul.f32 1.442695, %v1490_v48 }
 0x99b   :  { %1931 = vpow2.f32 %v1491_v50 }
 0x9a5   :  { %v1932_v51 = vpop.eup %1931 }
 0x9a6   :  { %v1493_v52 = vadd.f32 1.0, %v1932_v51 }
 0x9a8   :  { %1933 = vrcp.f32 %v1493_v52 }
 0x9b2   :  { %v1934_v43 = vpop.eup %1933 }
 0x9b3   :  { %1496 = vst.msk [vmem:[#allocation3] sm:$0x1] %vm1495_vm6, %v1934_v43 }
 0x9b4   :  { %1946 = shalt.err (!%p1943_p4)
}
 0x9b5   :  { %s1947_s9 = scalar_lea.hbm %s2547_s7, 16 }
 0x9b6   :  { %p1948_p5 = scmp.ne.s32.totalorder %s2547_s7, %s1947_s9  ;;  %p1951_p6 = scmp.lt.u32.totalorder %s1947_s9, %s2547_s7 }
 0x9b8   :  { %p1953_p7 = pnand %p1951_p6, %p1948_p5 }
 0x9ba   :  { %1956 = shalt.err (!%p1953_p7)
}
 0x9bb   :  { %1506 = dma.vmem_to_hbm [thread:$0]  %s1504_s2, 16, %s2547_s7, [#allocation4]  }
 0x9bc   :  { %1957 = dma.done.wait [#allocation4], 16  }
 0x9bd   :  { %1958 = vsyncadd [#allocation4], 4294967280 }
 0x9be   :  { %1510 = vsyncpa [#allocation4], 1 }

</bundles_post_ra>
